<compile_context>
chip_gen: v6e
topology: v6e:2x2x1
jax: 0.10.0
libtpu: 0.0.40
codegen_flags: <defaults>
</compile_context>

<pallas_src>
import functools

import jax
import jax.numpy as jnp
from jax import lax
from jax.experimental import pallas as pl
from jax.experimental.pallas import tpu as pltpu

K = 3        # kernel size
STRIDE = 2   # transposed-conv stride
EPS = 1e-5   # BatchNorm eps (PyTorch default)


def _deconv_bn_relu_kernel(pat_ref, w_ref, gamma_ref, beta_ref, o_ref, *, count):
    """Fused stride-2 transposed conv (phase decomposed) + BatchNorm + ReLU.

    pat_ref  : (4*Cin, Mp)   lane-dense im2col patch matrix, rows = taps [A,B,C,D]xCin,
                             columns = flattened (n, m, w') padded with zeros to Mp.
    w_ref    : (4*Cout, 4*Cin)  fused phase weight, rows = [ee, eo, oe, oo] x Cout.
    gamma_ref: (Cout, 1)     BN weight
    beta_ref : (Cout, 1)     BN bias
    o_ref    : (4*Cout, Mp)  phase-blocked, lane-dense output
                             o[b*Cout + c, n*Hp*Wp + m*Wp + w'] = out[n, c, 2m+rp, 2w'+cp]
                             with b = 2*rp + cp.
    count    : number of *valid* output elements N*Ho*Wo (static).
    """
    Cout = gamma_ref.shape[0]

    # ---- one fused MXU matmul: all 9 taps x all 4 output-parity phases -------------
    acc = jnp.dot(w_ref[...], pat_ref[...],
                  preferred_element_type=jnp.float32)          # (4*Cout, Mp), f32

    # ---- BatchNorm2d batch statistics: single pass over the lane axis (XLU) --------
    # Out-of-range phase slots and the Mp padding columns are exact zeros of the conv
    # output, so they contribute nothing to either sum; only `count` real elements
    # enter the denominators.  Conv bias is omitted (cancels under mean subtraction).
    s_row = jnp.sum(acc, axis=1, keepdims=True)                # (4*Cout, 1)
    ss_row = jnp.sum(acc * acc, axis=1, keepdims=True)         # (4*Cout, 1)
    # fold the 4 phase copies of each real channel (aligned sublane slices)
    s = (s_row[0 * Cout:1 * Cout] + s_row[1 * Cout:2 * Cout]
         + s_row[2 * Cout:3 * Cout] + s_row[3 * Cout:4 * Cout])      # (Cout, 1)
    ss = (ss_row[0 * Cout:1 * Cout] + ss_row[1 * Cout:2 * Cout]
          + ss_row[2 * Cout:3 * Cout] + ss_row[3 * Cout:4 * Cout])   # (Cout, 1)
    inv_cnt = jnp.float32(1.0 / count)
    mean = s * inv_cnt
    var = jnp.maximum(ss * inv_cnt - mean * mean, 0.0)          # biased variance
    scale = gamma_ref[...] * lax.rsqrt(var + EPS)               # (Cout, 1)
    shift = beta_ref[...] - mean * scale                        # (Cout, 1)

    # ---- normalize + ReLU: one full-width, lane-dense store -------------------------
    scale4 = jnp.concatenate([scale, scale, scale, scale], axis=0)   # (4*Cout, 1)
    shift4 = jnp.concatenate([shift, shift, shift, shift], axis=0)   # (4*Cout, 1)
    o_ref[...] = jnp.maximum(acc * scale4 + shift4, 0.0)


def _phase_weight(w_t):
    """(Cin, Cout, 3, 3) PyTorch ConvTranspose2d weight -> fused (4*Cin, 4*Cout).

    Rows : taps [A=x[m,n], B=x[m-1,n], C=x[m,n-1], D=x[m-1,n-1]] (Cin each)
    Cols : phase blocks [(row even, col even), (even, odd), (odd, even), (odd, odd)].
    """
    Cin, Cout = w_t.shape[0], w_t.shape[1]
    wt = w_t.astype(jnp.float32)
    zero = jnp.zeros((Cin, Cout), jnp.float32)

    def tap(kh, kw):
        return wt[:, :, kh, kw]

    col_ee = jnp.concatenate([tap(0, 0), tap(2, 0), tap(0, 2), tap(2, 2)], axis=0)
    col_eo = jnp.concatenate([tap(0, 1), tap(2, 1), zero,      zero],      axis=0)
    col_oe = jnp.concatenate([tap(1, 0), zero,      tap(1, 2), zero],      axis=0)
    col_oo = jnp.concatenate([tap(1, 1), zero,      zero,      zero],      axis=0)
    return jnp.concatenate([col_ee, col_eo, col_oe, col_oo], axis=1)   # (4*Cin, 4*Cout)


@jax.jit
def conv_trans_uint_for_pad(x_nchw, w_t, bias, gamma, beta):
    """x_nchw: (N, Cin, H, W); w_t: (Cin, Cout, 3, 3) PyTorch ConvTranspose2d weight."""
    N, Cin, H, W = x_nchw.shape
    Cout = w_t.shape[1]
    Hp, Wp = H + 1, W + 1
    Ho, Wo = (H - 1) * STRIDE + K, (W - 1) * STRIDE + K
    M = N * Hp * Wp
    Mp = ((M + 127) // 128) * 128           # lane-aligned flattened spatial extent
    del bias  # cancels exactly under training-mode BatchNorm (batch-mean subtraction)

    # ---- build the lane-dense, transposed im2col patch matrix in XLA (fused by jit).
    # Pure layout plumbing: ~40 KB of data replication; all compute stays in the kernel.
    x = x_nchw.astype(jnp.float32)
    xp = jnp.pad(x, ((0, 0), (0, 0), (1, 1), (1, 1)))           # (N, Cin, H+2, W+2)
    tap_a = xp[:, :, 1:Hp + 1, 1:Wp + 1]                        # x[m,   n]
    tap_b = xp[:, :, 0:Hp,     1:Wp + 1]                        # x[m-1, n]
    tap_c = xp[:, :, 1:Hp + 1, 0:Wp]                            # x[m,   n-1]
    tap_d = xp[:, :, 0:Hp,     0:Wp]                            # x[m-1, n-1]
    pat = jnp.stack([tap_a, tap_b, tap_c, tap_d], axis=0)       # (4, N, Cin, Hp, Wp)
    pat = jnp.transpose(pat, (0, 2, 1, 3, 4)).reshape(4 * Cin, M)
    pat = jnp.pad(pat, ((0, 0), (0, Mp - M)))                   # (4*Cin, Mp)

    w_fused_t = _phase_weight(w_t).T                            # (4*Cout, 4*Cin)

    vmem = pl.BlockSpec(memory_space=pltpu.MemorySpace.VMEM)
    kernel = functools.partial(_deconv_bn_relu_kernel, count=float(N * Ho * Wo))
    z = pl.pallas_call(
        kernel,
        out_shape=jax.ShapeDtypeStruct((4 * Cout, Mp), jnp.float32),
        in_specs=[vmem, vmem, vmem, vmem],
        out_specs=vmem,
    )(pat, w_fused_t,
      gamma.reshape(Cout, 1).astype(jnp.float32),
      beta.reshape(Cout, 1).astype(jnp.float32))

    # ---- phase un-interleave back to NCHW (stays in the jitted wrapper by design) ---
    z = z[:, :M].reshape(2, 2, Cout, N, Hp, Wp)                 # (rp, cp, co, n, m, w')
    y = jnp.transpose(z, (3, 2, 4, 0, 5, 1))                    # (n, co, m, rp, w', cp)
    y = y.reshape(N, Cout, 2 * Hp, 2 * Wp)[:, :, :Ho, :Wo]
    return y


def _reference(x_nchw, w_t, bias, gamma, beta):
    """Pure-JAX reference (XLA conv) for sanity checking; matches PyTorch semantics."""
    N, Cin, H, W = x_nchw.shape
    Cout = w_t.shape[1]
    x = jnp.transpose(x_nchw, (0, 2, 3, 1)).astype(jnp.float32)
    wf = jnp.transpose(w_t[:, :, ::-1, ::-1], (2, 3, 0, 1)).astype(jnp.float32)  # HWIO
    y = lax.conv_general_dilated(
        x, wf, window_strides=(1, 1),
        padding=[(K - 1, K - 1), (K - 1, K - 1)],
        lhs_dilation=(STRIDE, STRIDE),
        dimension_numbers=('NHWC', 'HWIO', 'NHWC'))
    y = y + bias.reshape(1, 1, 1, Cout)
    mean = jnp.mean(y, axis=(0, 1, 2), keepdims=True)
    var = jnp.mean((y - mean) ** 2, axis=(0, 1, 2), keepdims=True)
    y = (y - mean) * lax.rsqrt(var + EPS) * gamma.reshape(1, 1, 1, Cout) \
        + beta.reshape(1, 1, 1, Cout)
    y = jnp.maximum(y, 0.0)
    return jnp.transpose(y, (0, 3, 1, 2))


if __name__ == "__main__":
    in_ch, out_ch = 4, 8
    N, H, W = 2, 16, 16

    key = jax.random.PRNGKey(0)
    kx, kw, kb, kg, kbt = jax.random.split(key, 5)
    x = jax.random.normal(kx, (N, in_ch, H, W), jnp.float32)
    # nn.ConvTranspose2d weight: (in_ch, out_ch, 3, 3); bias: (out_ch,)
    w_t = jax.random.normal(kw, (in_ch, out_ch, K, K), jnp.float32) * 0.1
    bias = jax.random.normal(kb, (out_ch,), jnp.float32) * 0.1
    # nn.BatchNorm2d(out_ch): weight / bias of shape (out_ch,)
    gamma = 1.0 + 0.1 * jax.random.normal(kg, (out_ch,), jnp.float32)
    beta = 0.1 * jax.random.normal(kbt, (out_ch,), jnp.float32)

    out = jax.block_until_ready(conv_trans_uint_for_pad(x, w_t, bias, gamma, beta))
    ref = jax.block_until_ready(_reference(x, w_t, bias, gamma, beta))

    assert out.shape == (N, out_ch, 2 * H + 1, 2 * W + 1), out.shape
    err = float(jnp.max(jnp.abs(out - ref)))
    assert jnp.allclose(out, ref, atol=1e-4, rtol=1e-4), err
    print("KERNEL_OK")
</pallas_src>

<mosaic_0001>
module attributes {stable_mosaic.version = 11 : i64} {
  func.func @_deconv_bn_relu_kernel(%arg0: memref<16x640xf32, #tpu.memory_space<vmem>>, %arg1: memref<32x16xf32, #tpu.memory_space<vmem>>, %arg2: memref<8x1xf32, #tpu.memory_space<vmem>>, %arg3: memref<8x1xf32, #tpu.memory_space<vmem>>, %arg4: memref<32x640xf32, #tpu.memory_space<vmem>>) attributes {dimension_semantics = [], scalar_prefetch = 0 : i64, scratch_operands = 0 : i64, tpu.core_type = #tpu.core_type<tc>} {
    %c0 = arith.constant 0 : index
    %c0_0 = arith.constant 0 : index
    %0 = vector.load %arg1[%c0, %c0_0] : memref<32x16xf32, #tpu.memory_space<vmem>>, vector<32x16xf32>
    %c0_1 = arith.constant 0 : index
    %c0_2 = arith.constant 0 : index
    %1 = vector.load %arg0[%c0_1, %c0_2] : memref<16x640xf32, #tpu.memory_space<vmem>>, vector<16x640xf32>
    %cst = arith.constant dense<0.000000e+00> : vector<32x640xf32>
    %2 = tpu.matmul %0, %1, %cst {dimension_numbers = #tpu.dot_dimension_numbers<[1], [0], [0], [1], [0, 0, 1, 1], [], []>} : vector<32x16xf32>, vector<16x640xf32>, vector<32x640xf32> -> vector<32x640xf32>
    %cst_3 = arith.constant dense<0.000000e+00> : vector<32xf32>
    %3 = vector.multi_reduction <add>, %2, %cst_3 [1] : vector<32x640xf32> to vector<32xf32>
    %4 = vector.shape_cast %3 : vector<32xf32> to vector<32x1xf32>
    %5 = arith.mulf %2, %2 : vector<32x640xf32>
    %cst_4 = arith.constant dense<0.000000e+00> : vector<32xf32>
    %6 = vector.multi_reduction <add>, %5, %cst_4 [1] : vector<32x640xf32> to vector<32xf32>
    %7 = vector.shape_cast %6 : vector<32xf32> to vector<32x1xf32>
    %8 = vector.extract_strided_slice %4 {offsets = [0, 0], sizes = [8, 1], strides = [1, 1]} : vector<32x1xf32> to vector<8x1xf32>
    %9 = vector.extract_strided_slice %4 {offsets = [8, 0], sizes = [8, 1], strides = [1, 1]} : vector<32x1xf32> to vector<8x1xf32>
    %10 = arith.addf %8, %9 : vector<8x1xf32>
    %11 = vector.extract_strided_slice %4 {offsets = [16, 0], sizes = [8, 1], strides = [1, 1]} : vector<32x1xf32> to vector<8x1xf32>
    %12 = arith.addf %10, %11 : vector<8x1xf32>
    %13 = vector.extract_strided_slice %4 {offsets = [24, 0], sizes = [8, 1], strides = [1, 1]} : vector<32x1xf32> to vector<8x1xf32>
    %14 = arith.addf %12, %13 : vector<8x1xf32>
    %15 = vector.extract_strided_slice %7 {offsets = [0, 0], sizes = [8, 1], strides = [1, 1]} : vector<32x1xf32> to vector<8x1xf32>
    %16 = vector.extract_strided_slice %7 {offsets = [8, 0], sizes = [8, 1], strides = [1, 1]} : vector<32x1xf32> to vector<8x1xf32>
    %17 = arith.addf %15, %16 : vector<8x1xf32>
    %18 = vector.extract_strided_slice %7 {offsets = [16, 0], sizes = [8, 1], strides = [1, 1]} : vector<32x1xf32> to vector<8x1xf32>
    %19 = arith.addf %17, %18 : vector<8x1xf32>
    %20 = vector.extract_strided_slice %7 {offsets = [24, 0], sizes = [8, 1], strides = [1, 1]} : vector<32x1xf32> to vector<8x1xf32>
    %21 = arith.addf %19, %20 : vector<8x1xf32>
    %cst_5 = arith.constant 4.5913682E-4 : f32
    %22 = vector.broadcast %cst_5 : f32 to vector<8x1xf32>
    %23 = arith.mulf %14, %22 : vector<8x1xf32>
    %cst_6 = arith.constant 4.5913682E-4 : f32
    %24 = vector.broadcast %cst_6 : f32 to vector<8x1xf32>
    %25 = arith.mulf %21, %24 : vector<8x1xf32>
    %26 = arith.mulf %23, %23 : vector<8x1xf32>
    %27 = arith.subf %25, %26 : vector<8x1xf32>
    %cst_7 = arith.constant 0.000000e+00 : f32
    %28 = vector.broadcast %cst_7 : f32 to vector<8x1xf32>
    %29 = arith.maximumf %27, %28 : vector<8x1xf32>
    %c0_8 = arith.constant 0 : index
    %c0_9 = arith.constant 0 : index
    %30 = vector.load %arg2[%c0_8, %c0_9] : memref<8x1xf32, #tpu.memory_space<vmem>>, vector<8x1xf32>
    %cst_10 = arith.constant 9.99999974E-6 : f32
    %31 = vector.broadcast %cst_10 : f32 to vector<8x1xf32>
    %32 = arith.addf %29, %31 : vector<8x1xf32>
    %33 = math.rsqrt %32 : vector<8x1xf32>
    %34 = arith.mulf %30, %33 : vector<8x1xf32>
    %c0_11 = arith.constant 0 : index
    %c0_12 = arith.constant 0 : index
    %35 = vector.load %arg3[%c0_11, %c0_12] : memref<8x1xf32, #tpu.memory_space<vmem>>, vector<8x1xf32>
    %36 = arith.mulf %23, %34 : vector<8x1xf32>
    %37 = arith.subf %35, %36 : vector<8x1xf32>
    %38 = tpu.concatenate %34, %34, %34, %34 in 0 : vector<8x1xf32>, vector<8x1xf32>, vector<8x1xf32>, vector<8x1xf32> -> vector<32x1xf32>
    %39 = tpu.concatenate %37, %37, %37, %37 in 0 : vector<8x1xf32>, vector<8x1xf32>, vector<8x1xf32>, vector<8x1xf32> -> vector<32x1xf32>
    %40 = vector.broadcast %38 : vector<32x1xf32> to vector<32x640xf32>
    %41 = arith.mulf %2, %40 : vector<32x640xf32>
    %42 = vector.broadcast %39 : vector<32x1xf32> to vector<32x640xf32>
    %43 = arith.addf %41, %42 : vector<32x640xf32>
    %cst_13 = arith.constant 0.000000e+00 : f32
    %44 = vector.broadcast %cst_13 : f32 to vector<32x640xf32>
    %45 = arith.maximumf %43, %44 : vector<32x640xf32>
    %c0_14 = arith.constant 0 : index
    %c0_15 = arith.constant 0 : index
    %46 = vector.load %arg4[%c0_14, %c0_15] : memref<32x640xf32, #tpu.memory_space<vmem>>, vector<32x640xf32>
    tpu.vector_store %arg4[%c0_14, %c0_15], %45 {strides = array<i32>} : memref<32x640xf32, #tpu.memory_space<vmem>>, vector<32x640xf32>,
    return
  }
}

</mosaic_0001>

<bundles_post_ra>
// kernel: conv_trans_uint_for_pad.1
= control target key start
LH: loop header
LB: loop body
LE: loop exit
PB: predicated region body
PF: predicated region fallthrough
CT: control target
= control target key end

     0   :  { %v525_v3 = vmov 0.0   ;;  %vm31_vm0 = vcmask 130048   ;;  %s792_s0 = inlined_call_operand.vmem [shape: f32[16,640], index: 0, kind: input, shape index: {}]   ;;  %s793_s1 = inlined_call_operand.vmem [shape: f32[32,16], index: 1, kind: input, shape index: {}]   ;;  %s794_s2 = inlined_call_operand.vmem [shape: f32[8,1], index: 2, kind: input, shape index: {}]   ;;  %s795_s3 = inlined_call_operand.vmem [shape: f32[8,1], index: 3, kind: input, shape index: {}]   ;;  %s796_s4 = inlined_call_operand.vmem [shape: f32[32,640], index: 4, kind: output, shape index: {}]  }
   0x1   :  { %v27_v0 = vld [vmem:[%s792_s0 + $0x30] sm:$0xff]  ;;  %v26_v1 = vld [vmem:[%s792_s0 + $0x28] sm:$0xff]  ;;  %108 = vmatprep.mubr.f32.mxu0 %v525_v3  ;;  %126 = vmatprep.mubr.f32.mxu1 %v525_v3  ;;  %v21_v4 = vld [vmem:[%s792_s0] sm:$0xff] }
   0x2   :  { %v22_v2 = vld [vmem:[%s792_s0 + $0x8] sm:$0xff]  ;;  %72 = vmatprep.subr.mxu0 %v27_v0  ;;  %515 = vmatprep.subr.mxu1 %v27_v0  ;;  %v17_v5 = vld [vmem:[%s793_s1] sm:$0xff]  ;;  %v20_v6 = vld [vmem:[%s793_s1 + $0x18] sm:$0xff] }
   0x3   :  { %73 = vmatpush1.msra.mxu0 %v26_v1  ;;  %517 = vmatpush1.msra.mxu1 %v26_v1  ;;  %v29_v7 = vld [vmem:[%s792_s0 + $0x40] sm:$0xff]  ;;  %v30_v8 = vld [vmem:[%s792_s0 + $0x48] sm:$0xff]  ;;  %v28_v9 = vld [vmem:[%s792_s0 + $0x38] sm:$0xff] }
   0x4   :  { %74 = vmatprep.subr.mxu0 %v22_v2  ;;  %516 = vmatprep.subr.mxu1 %v22_v2  ;;  %v24_v10 = vld [vmem:[%s792_s0 + $0x18] sm:$0xff]  ;;  %v23_v11 = vld [vmem:[%s792_s0 + $0x10] sm:$0xff]  ;;  %v18_v12 = vld [vmem:[%s793_s1 + $0x8] sm:$0xff] }
   0x5   :  { %75 = vmatpush1.msra.mxu0 %v21_v4  ;;  %518 = vmatpush1.msra.mxu1 %v21_v4  ;;  %v25_v13 = vld [vmem:[%s792_s0 + $0x20] sm:$0xff]  ;;  %v19_v14 = vld [vmem:[%s793_s1 + $0x10] sm:$0xff] }
   0x6   :  { %487 = vmatmul.mubr.msk.f32.vlgmr.msra.gmra.mxu0 %vm31_vm0, %v17_v5  ;;  %490 = vmatmul.mubr.msk.f32.vlgmr.msra.gmra.mxu1 %vm31_vm0, %v20_v6 }
   0x7   :  { %161 = vmatprep.subr.mxu1 %v29_v7  ;;  %505 = vmatprep.subr.mxu0 %v30_v8 }
   0x8   :  { %162 = vmatpush1.msra.mxu1 %v28_v9  ;;  %506 = vmatpush3.msra.mxu0 %v30_v8 }
   0x9   :  { %163 = vmatprep.subr.mxu1 %v24_v10  ;;  %114 = vmatprep.mubr.f32.mxu0 %v525_v3 }
   0xa   :  { %164 = vmatpush1.msra.mxu1 %v23_v11  ;;  %197 = vmatprep.mubr.f32.mxu1 %v525_v3 }
   0xb   :  { %488 = vmatmul.mubr.msk.f32.gmra.mxu0 %vm31_vm0, %v18_v12  ;;  %491 = vmatmul.mubr.msk.f32.vlgmr.msra.gmra.mxu1 %vm31_vm0, %v17_v5 }
   0xc   :  { %507 = vmatprep.subr.mxu0 %v25_v13  ;;  %120 = vmatprep.mubr.f32.mxu0 %v525_v3 }
   0xd   :  { %203 = vmatprep.mubr.f32.mxu1 %v525_v3  ;;  %508 = vmatpush3.msra.mxu0 %v25_v13 }
   0xf   :  { %489 = vmatmul.mubr.msk.f32.gmra.mxu0 %vm31_vm0, %v19_v14  ;;  %492 = vmatmul.mubr.msk.f32.gmra.mxu1 %vm31_vm0, %v18_v12 }
  0x10   :  { %209 = vmatprep.mubr.f32.mxu1 %v525_v3  ;;  %509 = vmatprep.mubr.msk.f32.mxu0 %vm31_vm0, %v17_v5 }
  0x13   :  { %493 = vmatmul.mubr.msk.f32.gmra.mxu1 %vm31_vm0, %v19_v14  ;;  %510 = vmatmul.mubr.msk.f32.vlgmr.msra.gmra.mxu0 %vm31_vm0, %v18_v12 }
  0x14   :  { %215 = vmatprep.mubr.f32.mxu1 %v525_v3  ;;  %512 = vmatprep.mubr.msk.f32.mxu0 %vm31_vm0, %v19_v14 }
  0x17   :  { %494 = vmatmul.mubr.msk.f32.gmra.mxu1 %vm31_vm0, %v20_v6  ;;  %513 = vmatmul.mubr.msk.f32.gmra.mxu0 %vm31_vm0, %v20_v6 }
  0xc6   :  { %v606_v15 = vpop.f32.mrf.mxu0  ;;  %v608_v16 = vpop.f32.mrf.mxu1 }
  0xc7   :  { %v331_v20 = vmul.f32 %v606_v15, %v606_v15  ;;  %v346_v48 = vmul.f32 %v608_v16, %v608_v16 }
  0xc8   :  { %v610_v17 = vpop.f32.mrf.mxu0  ;;  %v612_v18 = vpop.f32.mrf.mxu1 }
  0xc9   :  { %v332_v19 = vmul.f32 %v610_v17, %v610_v17  ;;  %v307_v23 = vadd.f32 %v610_v17, %v606_v15  ;;  %v325_v51 = vadd.f32 %v612_v18, %v608_v16  ;;  %v347_v52 = vmul.f32 %v612_v18, %v612_v18 }
  0xcb   :  { %v618_v21 = vpop.f32.mrf.mxu0  ;;  %v620_v22 = vpop.f32.mrf.mxu1  ;;  %v351_v24 = vadd.f32 %v332_v19, %v331_v20  ;;  %v369_v5 = vadd.f32 %v347_v52, %v346_v48 }
  0xcc   :  { %v333_v25 = vmul.f32 %v620_v22, %v620_v22  ;;  %v336_v28 = vmul.f32 %v618_v21, %v618_v21  ;;  %v308_v36 = vadd.f32 %v307_v23, %v620_v22 }
  0xcd   :  { %v626_v26 = vpop.f32.mrf.mxu0  ;;  %v628_v27 = vpop.f32.mrf.mxu1 }
  0xce   :  { %v313_v29 = vadd.f32 %v626_v26, %v618_v21  ;;  %v337_v30 = vmul.f32 %v626_v26, %v626_v26  ;;  %v334_v37 = vmul.f32 %v628_v27, %v628_v27  ;;  %v352_v40 = vadd.f32 %v351_v24, %v333_v25 }
  0xcf   :  { %v636_v31 = vpop.f32.mrf.mxu0  ;;  %v638_v32 = vpop.f32.mrf.mxu1  ;;  %v309_v56 = vadd.f32 %v308_v36, %v628_v27 }
  0xd0   :  { %v357_v33 = vadd.f32 %v337_v30, %v336_v28  ;;  %v314_v34 = vadd.f32 %v313_v29, %v638_v32  ;;  %v338_v35 = vmul.f32 %v638_v32, %v638_v32  ;;  %v341_v49 = vmul.f32 %v636_v31, %v636_v31 }
  0xd1   :  { %v646_v38 = vpop.f32.mrf.mxu0  ;;  %v648_v39 = vpop.f32.mrf.mxu1  ;;  %v353_v55 = vadd.f32 %v352_v40, %v334_v37 }
  0xd2   :  { %v319_v41 = vadd.f32 %v646_v38, %v636_v31  ;;  %v342_v42 = vmul.f32 %v646_v38, %v646_v38  ;;  %v315_v43 = vadd.f32 %v314_v34, %v648_v39  ;;  %v339_v44 = vmul.f32 %v648_v39, %v648_v39 }
  0xd3   :  { %v657_v45 = vpop.f32.mrf.mxu1  ;;  %v659_v46 = vpop.f32.mrf.mxu0  ;;  %v358_v47 = vadd.f32 %v357_v33, %v338_v35  ;;  %v526_v33 = vmov 0  }
  0xd4   :  { %v316_v50 = vadd.f32 %v659_v46, %v315_v43  ;;  %v363_v57 = vadd.f32 %v342_v42, %v341_v49  ;;  %v320_v58 = vadd.f32 %v319_v41, %v657_v45  ;;  %v343_v59 = vmul.f32 %v657_v45, %v657_v45  ;;  %521 = vset.pattern.permute.xlu0 %v526_v33 }
  0xd5   :  { %v670_v53 = vpop.f32.mrf.mxu1  ;;  %v672_v54 = vpop.f32.mrf.mxu0  ;;  %v340_v63 = vmul.f32 %v659_v46, %v659_v46  ;;  %v359_v0 = vadd.f32 %v358_v47, %v339_v44  ;;  %522 = vset.pattern.permute.xlu1 %v526_v33 }
  0xd6   :  { %317 = vadd.xlane.f32.xlu0 %v316_v50  ;;  %v335_v60 = vmul.f32 %v672_v54, %v672_v54  ;;  %v310_v4 = vadd.f32 %v309_v56, %v672_v54  ;;  %v344_v8 = vmul.f32 %v670_v53, %v670_v53  ;;  %v321_v9 = vadd.f32 %v320_v58, %v670_v53 }
  0xd7   :  { %v680_v61 = vpop.f32.mrf.mxu1  ;;  %v682_v62 = vpop.f32.mrf.mxu0  ;;  %v364_v10 = vadd.f32 %v363_v57, %v343_v59  ;;  %v360_v12 = vadd.f32 %v359_v0, %v340_v63 }
  0xd8   :  { %v326_v1 = vadd.f32 %v325_v51, %v680_v61  ;;  %v348_v2 = vmul.f32 %v680_v61, %v680_v61  ;;  %v354_v3 = vadd.f32 %v353_v55, %v335_v60  ;;  %v350_v29 = vmul.f32 %v682_v62, %v682_v62  ;;  %v386_v60 = vld [vmem:[%s794_s2] sm:$0xff] }
  0xd9   :  { %v690_v6 = vpop.f32.mrf.mxu1  ;;  %v692_v7 = vpop.f32.mrf.mxu0  ;;  %v365_v23 = vadd.f32 %v364_v10, %v344_v8 }
  0xda   :  { %355 = vadd.xlane.f32.xlu1 %v354_v3  ;;  %311 = vadd.xlane.f32.xlu0 %v310_v4  ;;  %v327_v11 = vadd.f32 %v326_v1, %v690_v6  ;;  %v349_v13 = vmul.f32 %v690_v6, %v690_v6  ;;  %v345_v14 = vmul.f32 %v692_v7, %v692_v7  ;;  %v390_v1 = vld [vmem:[%s795_s3] sm:$0xff] }
  0xdb   :  { %v322_v19 = vadd.f32 %v321_v9, %v692_v7  ;;  %v370_v20 = vadd.f32 %v369_v5, %v348_v2 }
  0xdc   :  { %v366_v24 = vadd.f32 %v365_v23, %v345_v14  ;;  %v328_v25 = vadd.f32 %v682_v62, %v327_v11 }
  0xdd   :  { %v371_v28 = vadd.f32 %v370_v20, %v349_v13 }
  0xde   :  { %361 = vadd.xlane.f32.xlu0 %v360_v12  ;;  %323 = vadd.xlane.f32.xlu1 %v322_v19 }
  0xdf   :  { %v372_v30 = vadd.f32 %v371_v28, %v350_v29 }
  0xe2   :  { %367 = vadd.xlane.f32.xlu0 %v366_v24  ;;  %329 = vadd.xlane.f32.xlu1 %v328_v25 }
  0xe6   :  { %373 = vadd.xlane.f32.xlu1 %v372_v30 }
 0x15f   :  { %v318_v34 = vpop.xlane.xlu0 %317 }
 0x163   :  { %v356_v35 = vpop.xlane.xlu1 %355  ;;  %v312_v36 = vpop.xlane.xlu0 %311 }
 0x164   :  { %v375_v41 = vadd.f32 %v318_v34, %v312_v36 }
 0x167   :  { %v362_v37 = vpop.xlane.xlu0 %361  ;;  %v324_v40 = vpop.xlane.xlu1 %323 }
 0x168   :  { %v376_v42 = vadd.f32 %v375_v41, %v324_v40  ;;  %v378_v47 = vadd.f32 %v362_v37, %v356_v35 }
 0x16b   :  { %v368_v43 = vpop.xlane.xlu0 %367  ;;  %v330_v44 = vpop.xlane.xlu1 %329 }
 0x16c   :  { %v377_v48 = vadd.f32 %v376_v42, %v330_v44  ;;  %v379_v49 = vadd.f32 %v378_v47, %v368_v43 }
 0x16e   :  { %v381_v50 = vmul.f32 0.00045913682, %v377_v48 }
 0x16f   :  { %v374_v51 = vpop.xlane.xlu1 %373 }
 0x170   :  { %v380_v52 = vadd.f32 %v379_v49, %v374_v51  ;;  %v383_v55 = vmul.f32 %v381_v50, %v381_v50 }
 0x172   :  { %v382_v56 = vmul.f32 0.00045913682, %v380_v52 }
 0x174   :  { %v384_v57 = vsub.f32 %v382_v56, %v383_v55 }
 0x176   :  { %v385_v58 = vmax.f32 %v384_v57, 0.0 }
 0x178   :  { %v387_v59 = vadd.f32 1e-05, %v385_v58 }
 0x17a   :  { %523 = vrsqrt.f32 %v387_v59 }
 0x187   :  { %v524_v63 = vpop.eup %523 }
 0x188   :  { %v389_v0 = vmul.f32 %v524_v63, %v386_v60 }
 0x18a   :  { %395 = vperm.xlu0 %521, %v389_v0   ;;  %v391_v2 = vmul.f32 %v389_v0, %v381_v50 }
 0x18c   :  { %v392_v3 = vsub.f32 %v390_v1, %v391_v2 }
 0x18e   :  { %420 = vperm.xlu1 %522, %v392_v3  }
 0x205   :  { %v396_v4 = vpop.permute.xlu0 %395 }
 0x206   :  { %v398_v5 = vmul.f32 %v396_v4, %v606_v15  ;;  %v399_v8 = vmul.f32 %v396_v4, %v610_v17  ;;  %v400_v9 = vmul.f32 %v396_v4, %v620_v22  ;;  %v401_v10 = vmul.f32 %v396_v4, %v628_v27 }
 0x207   :  { %v402_v11 = vmul.f32 %v396_v4, %v672_v54  ;;  %v403_v12 = vmul.f32 %v396_v4, %v618_v21  ;;  %v404_v13 = vmul.f32 %v396_v4, %v626_v26  ;;  %v405_v14 = vmul.f32 %v396_v4, %v638_v32 }
 0x208   :  { %v406_v19 = vmul.f32 %v396_v4, %v648_v39  ;;  %v407_v20 = vmul.f32 %v659_v46, %v396_v4  ;;  %v408_v15 = vmul.f32 %v396_v4, %v636_v31  ;;  %v409_v17 = vmul.f32 %v396_v4, %v646_v38 }
 0x209   :  { %v410_v22 = vmul.f32 %v396_v4, %v657_v45  ;;  %v411_v27 = vmul.f32 %v396_v4, %v670_v53  ;;  %v412_v54 = vmul.f32 %v396_v4, %v692_v7  ;;  %v413_v21 = vmul.f32 %v396_v4, %v608_v16  ;;  %v421_v23 = vpop.permute.xlu1 %420 }
 0x20a   :  { %v414_v26 = vmul.f32 %v396_v4, %v612_v18  ;;  %v415_v32 = vmul.f32 %v396_v4, %v680_v61  ;;  %v416_v39 = vmul.f32 %v396_v4, %v690_v6  ;;  %v417_v46 = vmul.f32 %v682_v62, %v396_v4 }
 0x20b   :  { %v423_v31 = vadd.f32 %v421_v23, %v398_v5  ;;  %v424_v24 = vadd.f32 %v421_v23, %v399_v8  ;;  %v425_v38 = vadd.f32 %v421_v23, %v400_v9  ;;  %v426_v25 = vadd.f32 %v421_v23, %v401_v10 }
 0x20c   :  { %v427_v45 = vadd.f32 %v421_v23, %v402_v11  ;;  %v428_v28 = vadd.f32 %v421_v23, %v403_v12  ;;  %v429_v53 = vadd.f32 %v421_v23, %v404_v13  ;;  %v430_v29 = vadd.f32 %v421_v23, %v405_v14 }
 0x20d   :  { %v431_v7 = vadd.f32 %v421_v23, %v406_v19  ;;  %v432_v30 = vadd.f32 %v421_v23, %v407_v20  ;;  %v433_v16 = vadd.f32 %v421_v23, %v408_v15  ;;  %v434_v33 = vadd.f32 %v421_v23, %v409_v17 }
 0x20e   :  { %v435_v34 = vadd.f32 %v421_v23, %v410_v22  ;;  %v436_v18 = vadd.f32 %v421_v23, %v411_v27  ;;  %v437_v35 = vadd.f32 %v421_v23, %v412_v54  ;;  %v438_v61 = vadd.f32 %v421_v23, %v413_v21 }
 0x20f   :  { %v439_v36 = vadd.f32 %v421_v23, %v414_v26  ;;  %v440_v6 = vadd.f32 %v421_v23, %v415_v32  ;;  %v441_v37 = vadd.f32 %v421_v23, %v416_v39  ;;  %v442_v62 = vadd.f32 %v421_v23, %v417_v46 }
 0x210   :  { %v443_v40 = vmax.f32 %v423_v31, 0.0  ;;  %v444_v41 = vmax.f32 %v424_v24, 0.0  ;;  %v445_v42 = vmax.f32 %v425_v38, 0.0  ;;  %v446_v43 = vmax.f32 %v426_v25, 0.0 }
 0x211   :  { %v447_v44 = vmax.f32 %v427_v45, 0.0  ;;  %v448_v47 = vmax.f32 %v428_v28, 0.0  ;;  %v449_v48 = vmax.f32 %v429_v53, 0.0  ;;  %v450_v49 = vmax.f32 %v430_v29, 0.0 }
 0x212   :  { %v451_v50 = vmax.f32 %v431_v7, 0.0  ;;  %v452_v51 = vmax.f32 %v432_v30, 0.0  ;;  %v453_v52 = vmax.f32 %v433_v16, 0.0  ;;  %v454_v55 = vmax.f32 %v434_v33, 0.0  ;;  %463 = vst [vmem:[%s796_s4] sm:$0xff] %v443_v40  ;;  %464 = vst [vmem:[%s796_s4 + $0x8] sm:$0xff] %v444_v41 }
 0x213   :  { %465 = vst [vmem:[%s796_s4 + $0x10] sm:$0xff] %v445_v42  ;;  %466 = vst [vmem:[%s796_s4 + $0x18] sm:$0xff] %v446_v43  ;;  %v455_v56 = vmax.f32 %v435_v34, 0.0  ;;  %v456_v57 = vmax.f32 %v436_v18, 0.0  ;;  %v457_v58 = vmax.f32 %v437_v35, 0.0  ;;  %v458_v59 = vmax.f32 %v438_v61, 0.0 }
 0x214   :  { %467 = vst [vmem:[%s796_s4 + $0x20] sm:$0xff] %v447_v44  ;;  %468 = vst [vmem:[%s796_s4 + $0x28] sm:$0xff] %v448_v47  ;;  %v459_v60 = vmax.f32 %v439_v36, 0.0  ;;  %v460_v63 = vmax.f32 %v440_v6, 0.0  ;;  %v461_v0 = vmax.f32 %v441_v37, 0.0  ;;  %v462_v1 = vmax.f32 %v442_v62, 0.0 }
 0x215   :  { %469 = vst [vmem:[%s796_s4 + $0x30] sm:$0xff] %v449_v48  ;;  %470 = vst [vmem:[%s796_s4 + $0x38] sm:$0xff] %v450_v49 }
 0x216   :  { %471 = vst [vmem:[%s796_s4 + $0x40] sm:$0xff] %v451_v50  ;;  %472 = vst [vmem:[%s796_s4 + $0x48] sm:$0xff] %v452_v51 }
 0x217   :  { %473 = vst [vmem:[%s796_s4 + $0x50] sm:$0xff] %v453_v52  ;;  %474 = vst [vmem:[%s796_s4 + $0x58] sm:$0xff] %v454_v55 }
 0x218   :  { %475 = vst [vmem:[%s796_s4 + $0x60] sm:$0xff] %v455_v56  ;;  %476 = vst [vmem:[%s796_s4 + $0x68] sm:$0xff] %v456_v57 }
 0x219   :  { %477 = vst [vmem:[%s796_s4 + $0x70] sm:$0xff] %v457_v58  ;;  %478 = vst [vmem:[%s796_s4 + $0x78] sm:$0xff] %v458_v59 }
 0x21a   :  { %479 = vst [vmem:[%s796_s4 + $0x80] sm:$0xff] %v459_v60  ;;  %480 = vst [vmem:[%s796_s4 + $0x88] sm:$0xff] %v460_v63 }
 0x21b   :  { %481 = vst [vmem:[%s796_s4 + $0x90] sm:$0xff] %v461_v0  ;;  %482 = vst [vmem:[%s796_s4 + $0x98] sm:$0xff] %v462_v1 }

</bundles_post_ra>
